<compile_context>
chip_gen: v6e
topology: v6e:2x2x1
jax: 0.10.0
libtpu: 0.0.40
codegen_flags: <defaults>
</compile_context>

<pallas_src>
import jax
import jax.numpy as jnp
from jax.experimental import pallas as pl
from jax.experimental.pallas import tpu as pltpu


def _fused_conv_kernel(x_ref, w_ref, o_ref):
    """out = W_aug @ x_aug for one lane block.

    x_ref : (K, LB)    augmented input  [x ; ones ; rim_mask]
    w_ref : (Cout, K)  augmented weight [6*W2@W1 | c_in | c_rim - c_in]
    o_ref : (Cout, LB) lane-dense output block
    """
    o_ref[...] = jnp.dot(
        w_ref[...], x_ref[...],
        preferred_element_type=jnp.float32,
        precision=jax.lax.Precision.HIGHEST,
    ).astype(o_ref.dtype)


@jax.jit
def model_forward(x_nchw, w1, b1, w2, b2):
    """Mirrors Model.forward (with the 8->8 reinterpretation of conv #2).

    x_nchw : (N, Cin, H, W) float32  ->  (N, Cout, H+4, W+4) float32
    """
    N, Cin, H, W = x_nchw.shape
    Cmid = w1.shape[0]
    Cout = w2.shape[0]
    pad = 2                                      # two 1x1 convs, each padding=1
    Hp, Wp = H + 2 * pad, W + 2 * pad
    P = Hp * Wp
    L = N * P

    # --- fold the two affine convs + epilogue (tiny folds, done at HIGHEST) ---
    hp = jax.lax.Precision.HIGHEST
    W1m = w1.reshape(Cmid, Cin)
    W2m = w2.reshape(Cout, Cmid)
    w_fused = 6.0 * jnp.dot(W2m, W1m, precision=hp)            # (Cout, Cin)
    c_in = 6.0 * (jnp.dot(W2m, b1, precision=hp) + b2 + 3.0)   # interior/ring-1
    c_rim = 6.0 * (b2 + 3.0)                                   # outermost ring
    w_aug = jnp.concatenate(
        [w_fused, c_in[:, None], (c_rim - c_in)[:, None]], axis=1)  # (Cout, K)
    K = Cin + 2

    # --- augmented input: zero-pad spatially by 2, channel-first, lane-last ---
    xp = jnp.pad(x_nchw, ((0, 0), (0, 0), (pad, pad), (pad, pad)))
    x_flat = jnp.transpose(xp, (1, 0, 2, 3)).reshape(Cin, L)

    rr = jax.lax.broadcasted_iota(jnp.int32, (Hp, Wp), 0)
    cc = jax.lax.broadcasted_iota(jnp.int32, (Hp, Wp), 1)
    rim = (rr == 0) | (rr == Hp - 1) | (cc == 0) | (cc == Wp - 1)
    rim = jnp.tile(rim.reshape(P).astype(x_nchw.dtype), (N,)).reshape(1, L)
    ones = jnp.ones((1, L), x_nchw.dtype)
    x_aug = jnp.concatenate([x_flat, ones, rim], axis=0)       # (K, L)

    # --- lane-align and split into >= 2 parallel blocks --------------------
    LANE = 128
    max_lanes_per_block = 32768                  # ~1 MiB f32 output per step
    n_blocks = max(2, -(-L // max_lanes_per_block))
    lb = -(-L // (n_blocks * LANE)) * LANE       # 128-multiple block width
    l_pad = n_blocks * lb
    x_aug = jnp.pad(x_aug, ((0, 0), (0, l_pad - L)))   # extra lanes are zero
                                                        # and sliced off below

    out_flat = pl.pallas_call(
        _fused_conv_kernel,
        out_shape=jax.ShapeDtypeStruct((Cout, l_pad), x_nchw.dtype),
        grid=(n_blocks,),
        in_specs=[
            pl.BlockSpec((K, lb), lambda i: (0, i)),
            pl.BlockSpec((Cout, K), lambda i: (0, 0)),
        ],
        out_specs=pl.BlockSpec((Cout, lb), lambda i: (0, i)),
        compiler_params=pltpu.CompilerParams(
            dimension_semantics=("parallel",)),
    )(x_aug, w_aug)

    out = out_flat[:, :L].reshape(Cout, N, Hp, Wp)
    return jnp.transpose(out, (1, 0, 2, 3))


def _reference(x_nchw, w1, b1, w2, b2):
    # Pure-jnp reference: two explicit 1x1 convs with padding=1, then (x+3)*6.
    def conv1x1_pad1(x, w, b):
        xp = jnp.pad(x, ((0, 0), (0, 0), (1, 1), (1, 1)))
        y = jnp.einsum("oc,nchw->nohw", w.reshape(w.shape[0], w.shape[1]), xp,
                       precision=jax.lax.Precision.HIGHEST)
        return y + b.reshape(1, -1, 1, 1)

    v1 = conv1x1_pad1(x_nchw, w1, b1)
    v2 = conv1x1_pad1(v1, w2, b2)
    return (v2 + 3.0) * 6.0


if __name__ == "__main__":
    key = jax.random.PRNGKey(0)
    k_x, k_w1, k_b1, k_w2, k_b2 = jax.random.split(key, 5)

    # Spec shape: x1 = torch.randn(1, 3, 64, 64)
    N, Cin, H, W = 1, 3, 64, 64
    Cmid = Cout = 8

    x1 = jax.random.normal(k_x, (N, Cin, H, W), dtype=jnp.float32)
    w1 = 0.1 * jax.random.normal(k_w1, (Cmid, Cin, 1, 1), dtype=jnp.float32)
    b1 = 0.1 * jax.random.normal(k_b1, (Cmid,), dtype=jnp.float32)
    w2 = 0.1 * jax.random.normal(k_w2, (Cout, Cmid, 1, 1), dtype=jnp.float32)
    b2 = 0.1 * jax.random.normal(k_b2, (Cout,), dtype=jnp.float32)

    out = jax.block_until_ready(model_forward(x1, w1, b1, w2, b2))
    ref = _reference(x1, w1, b1, w2, b2)

    assert out.shape == (N, Cout, H + 4, W + 4), out.shape
    assert jnp.allclose(out, ref, atol=1e-3, rtol=1e-4), float(
        jnp.max(jnp.abs(out - ref)))

    print("KERNEL_OK")
</pallas_src>

<mosaic_0001>
module attributes {stable_mosaic.version = 11 : i64} {
  func.func @_fused_conv_kernel(%arg0: i32, %arg1: memref<5x2432xf32, #tpu.memory_space<vmem>>, %arg2: memref<8x5xf32, #tpu.memory_space<vmem>>, %arg3: memref<8x2432xf32, #tpu.memory_space<vmem>>) attributes {dimension_semantics = [#tpu.dimension_semantics<parallel>], iteration_bounds = array<i64: 2>, scalar_prefetch = 0 : i64, scratch_operands = 0 : i64, tpu.core_type = #tpu.core_type<tc>, window_params = [{transform_indices = @transform_0, window_bounds = array<i64: 5, 2432>}, {pipeline_mode = #tpu.pipeline_mode<synchronous>, transform_indices = @transform_1, window_bounds = array<i64: 8, 5>}, {transform_indices = @transform_2, window_bounds = array<i64: 8, 2432>}]} {
    %c0 = arith.constant 0 : index
    %c0_0 = arith.constant 0 : index
    %0 = vector.load %arg2[%c0, %c0_0] : memref<8x5xf32, #tpu.memory_space<vmem>>, vector<8x5xf32>
    %c0_1 = arith.constant 0 : index
    %c0_2 = arith.constant 0 : index
    %1 = vector.load %arg1[%c0_1, %c0_2] : memref<5x2432xf32, #tpu.memory_space<vmem>>, vector<5x2432xf32>
    %cst = arith.constant dense<0.000000e+00> : vector<8x2432xf32>
    %2 = tpu.matmul %0, %1, %cst {dimension_numbers = #tpu.dot_dimension_numbers<[1], [0], [0], [1], [0, 0, 1, 1], [], []>, precision = #tpu.contract_precision<fp32>} : vector<8x5xf32>, vector<5x2432xf32>, vector<8x2432xf32> -> vector<8x2432xf32>
    %c0_3 = arith.constant 0 : index
    %c0_4 = arith.constant 0 : index
    %3 = vector.load %arg3[%c0_3, %c0_4] : memref<8x2432xf32, #tpu.memory_space<vmem>>, vector<8x2432xf32>
    tpu.vector_store %arg3[%c0_3, %c0_4], %2 {strides = array<i32>} : memref<8x2432xf32, #tpu.memory_space<vmem>>, vector<8x2432xf32>,
    return
  }
  func.func @transform_0(%arg0: i32) -> (i32, i32) {
    %c0_i32 = arith.constant 0 : i32
    %c0_i32_0 = arith.constant 0 : i32
    return %c0_i32, %arg0 : i32, i32
  }
  func.func @transform_1(%arg0: i32) -> (i32, i32) {
    %c0_i32 = arith.constant 0 : i32
    %c0_i32_0 = arith.constant 0 : i32
    %c0_i32_1 = arith.constant 0 : i32
    return %c0_i32, %c0_i32_0 : i32, i32
  }
  func.func @transform_2(%arg0: i32) -> (i32, i32) {
    %c0_i32 = arith.constant 0 : i32
    %c0_i32_0 = arith.constant 0 : i32
    return %c0_i32, %arg0 : i32, i32
  }
}

</mosaic_0001>

<bundles_post_ra>
// kernel: model_forward.1
= control target key start
LH: loop header
LB: loop body
LE: loop exit
PB: predicated region body
PF: predicated region fallthrough
CT: control target
= control target key end

     0   :  { %s5021_s9 = smov 0   ;;  %s5397_s0 = inlined_call_operand.vmem [shape: f32[5,4864], index: 0, kind: input, shape index: {}]   ;;  %s5398_s1 = inlined_call_operand.vmem [shape: f32[8,5], index: 1, kind: input, shape index: {}]   ;;  %s5399_s2 = inlined_call_operand.vmem [shape: f32[8,4864], index: 2, kind: output, shape index: {}]  }
   0x1 LB: > { %s4935_s10 = sadd.s32 4294967295, %s5002_s9   ;;  %p4939_p0 = scmp.ge.s32.totalorder %s5002_s9, 1  ;;  %s5002_s9 = sphi %s5021_s9, %s12_s9  }
   0x2   : > { %p113_p1 = scmp.lt.s32.totalorder %s5002_s9, 3 }
   0x4   : > { %p114_p2 = pnand %p4939_p0, %p113_p1 }
   0x5   : > { %s135_s11 = smul.u32 (!%p114_p2), 19, %s4935_s10 }
   0x6   : > { %117 = sbr.rel (%p114_p2) target bundleno = 342 (0x156), region = 28 }
   0x7   : > { %p136_p3 = scmp.lt.s32.totalorder (!%p114_p2), %s135_s11, 37 }
   0xb   : > { %v147_v0 = vld [vmem:[%s5398_s1] sm:$0xff]  ;;  %vm167_vm0 = vcmask 39936   ;;  %v5004_v1 = vmov 0.0   ;;  %s5401_s11 = smov (!%p136_p3, %s135_s11), 37  ;;  %vm171_vm1 = vcmask 1044480   ;;  %vm5005_vm2 = vmmov 0  }
   0xc   : > { %295 = vmatprep.mubr.f32.mxu0 %v5004_v1  ;;  %v169_v2 = vsel %vm167_vm0, %v147_v0, 0  ;;  %381 = vmatprep.mubr.f32.mxu1 %v5004_v1  ;;  %s4940_s14 = sshll.u32 %s5401_s11, 3 }
   0xd   : > { %v5034_v3 = vand.u32 4294901760, %v169_v2  ;;  %s5050_s17 = scalar_lea.vmem %s5397_s0, %s4940_s14  ;;  %s5373_s20 = scalar_lea.vmem %s5399_s2, %s4940_s14 }
   0xe   : > { %v149_v6 = vld [vmem:[%s5050_s17 + $0x8] sm:$0x1f]  ;;  %v148_v7 = vld [vmem:[%s5050_s17] sm:$0x1f]  ;;  %v151_v9 = vld [vmem:[%s5050_s17 + $0x18] sm:$0x1f] }
   0xf   : > { %v5039_v4 = vsub.f32 %v169_v2, %v5034_v3  ;;  %v176_v10 = vsel %vm171_vm1, %v149_v6, 0  ;;  %v173_v11 = vsel %vm171_vm1, %v148_v7, 0  ;;  %v182_v12 = vsel %vm171_vm1, %v151_v9, 0  ;;  %v150_v13 = vld [vmem:[%s5050_s17 + $0x10] sm:$0x1f] }
  0x10   : > { %v259_v14 = vand.u32 4294901760, %v176_v10  ;;  %v261_v15 = vand.u32 4294901760, %v173_v11  ;;  %v5063_v17 = vand.u32 4294901760, %v182_v12  ;;  %v179_v18 = vsel %vm171_vm1, %v150_v13, 0  ;;  %v153_v25 = vld [vmem:[%s5050_s17 + $0x28] sm:$0x1f] }
  0x11   : > { %v5043_v5 = vand.u32 4294901760, %v5039_v4  ;;  %v5066_v21 = vand.u32 4294901760, %v179_v18  ;;  %v188_v30 = vsel %vm171_vm1, %v153_v25, 0  ;;  %v152_v31 = vld [vmem:[%s5050_s17 + $0x20] sm:$0x1f] }
  0x12   : > { %260 = vmatprep.subr.mxu0 %v259_v14  ;;  %v338_v19 = vsub.f32 %v176_v10, %v259_v14  ;;  %v344_v20 = vsub.f32 %v173_v11, %v261_v15  ;;  %v5069_v22 = vsub.f32 %v182_v12, %v5063_v17  ;;  %v5085_v36 = vand.u32 4294901760, %v188_v30  ;;  %v161_v38 = vld [vmem:[%s5050_s17 + $0x68] sm:$0x1f]  ;;  %v160_v39 = vld [vmem:[%s5050_s17 + $0x60] sm:$0x1f] }
  0x13   : > { %v299_v8 = vsub.f32 %v5039_v4, %v5043_v5  ;;  %262 = vmatpush1.msra.mxu0 %v261_v15  ;;  %v5075_v26 = vsub.f32 %v179_v18, %v5066_v21  ;;  %v185_v37 = vsel %vm171_vm1, %v152_v31, 0  ;;  %v163_v40 = vld [vmem:[%s5050_s17 + $0x78] sm:$0x1f]  ;;  %v5101_v45 = vsel %vm171_vm1, %v161_v38, 0  ;;  %v162_v46 = vld [vmem:[%s5050_s17 + $0x70] sm:$0x1f] }
  0x14   : > { %v339_v23 = vand.u32 4294901760, %v338_v19  ;;  %421 = vmatprep.subr.mxu0 %v338_v19  ;;  %v345_v24 = vand.u32 4294901760, %v344_v20  ;;  %v804_v29 = vand.u32 4294901760, %v5069_v22  ;;  %v5094_v42 = vand.u32 4294901760, %v185_v37  ;;  %v155_v47 = vld [vmem:[%s5050_s17 + $0x38] sm:$0x1f] }
  0x15   : > { %v5061_v16 = vand.u32 4294901760, %v299_v8  ;;  %v810_v34 = vand.u32 4294901760, %v5075_v26  ;;  %v5098_v44 = vsub.f32 %v188_v30, %v5085_v36  ;;  %v5108_v48 = vsel %vm171_vm1, %v160_v39, 0  ;;  %v154_v55 = vld [vmem:[%s5050_s17 + $0x30] sm:$0x1f] }
  0x16   : > { %v340_v27 = vsub.f32 %v338_v19, %v339_v23  ;;  %v346_v28 = vsub.f32 %v344_v20, %v345_v24  ;;  %v805_v35 = vsub.f32 %v5069_v22, %v804_v29  ;;  %v5111_v49 = vsel %vm171_vm1, %v163_v40, 0  ;;  %v165_v56 = vld [vmem:[%s5050_s17 + $0x88] sm:$0x1f]  ;;  %v164_v57 = vld [vmem:[%s5050_s17 + $0x80] sm:$0x1f] }
  0x17   : > { %301 = vmatmul.mubr.f32.vlgmr.msra.gmra.mxu0 %v5061_v16  ;;  %v811_v41 = vsub.f32 %v5075_v26, %v810_v34  ;;  %v5117_v51 = vsub.f32 %v185_v37, %v5094_v42  ;;  %v5120_v52 = vsel %vm171_vm1, %v162_v46, 0  ;;  %v1269_v53 = vand.u32 4294901760, %v5098_v44  ;;  %v166_v58 = vld [vmem:[%s5050_s17 + $0x90] sm:$0x1f]  ;;  %v157_v10 = vld [vmem:[%s5050_s17 + $0x48] sm:$0x1f] }
  0x18   : > { %424 = vmatpush1.msra.mxu0 %v344_v20  ;;  %457 = vmatprep.mubr.f32.mxu0 %v5004_v1  ;;  %v341_v32 = vand.u32 4294901760, %v340_v27  ;;  %v347_v33 = vand.u32 4294901760, %v346_v28  ;;  %v806_v43 = vand.u32 4294901760, %v805_v35  ;;  %v194_v54 = vsel %vm171_vm1, %v155_v47, 0  ;;  %v159_v25 = vld [vmem:[%s5050_s17 + $0x58] sm:$0x1f] }
  0x19   : > { %575 = vmatprep.subr.mxu0 %v339_v23  ;;  %v812_v50 = vand.u32 4294901760, %v811_v41  ;;  %v1275_v59 = vand.u32 4294901760, %v5117_v51  ;;  %v5134_v60 = vand.u32 4294901760, %v194_v54  ;;  %v191_v61 = vsel %vm171_vm1, %v154_v55, 0  ;;  %v158_v30 = vld [vmem:[%s5050_s17 + $0x50] sm:$0x1f] }
  0x1a   : > { %342 = vmatprep.subr.mxu1 %v341_v32  ;;  %v1270_v62 = vsub.f32 %v5098_v44, %v1269_v53  ;;  %v5141_v63 = vsel %vm171_vm1, %v165_v56, 0  ;;  %v5144_v0 = vsel %vm171_vm1, %v164_v57, 0  ;;  %v5147_v2 = vsel %vm171_vm1, %v166_v58, 0 }
  0x1b   : > { %460 = vmatmul.mubr.f32.vlgmr.msra.gmra.mxu0 %v5039_v4  ;;  %348 = vmatpush1.msra.mxu1 %v347_v33  ;;  %v1276_v6 = vsub.f32 %v5117_v51, %v1275_v59  ;;  %v5155_v7 = vand.u32 4294901760, %v191_v61  ;;  %v1733_v9 = vsub.f32 %v194_v54, %v5134_v60  ;;  %v5239_v47 = vand.u32 4294901760, %v5108_v48 }
  0x1c   : > { %579 = vmatpush1.msra.mxu0 %v345_v24  ;;  %612 = vmatprep.mubr.f32.mxu0 %v5004_v1  ;;  %v1271_v8 = vand.u32 4294901760, %v1270_v62  ;;  %v5267_v58 = vand.u32 4294901760, %v5120_v52 }
  0x1d   : > { %725 = vmatprep.subr.mxu0 %v5063_v17  ;;  %383 = vmatmul.mubr.f32.vlgmr.msra.gmra.mxu1 %v5034_v3  ;;  %v1277_v11 = vand.u32 4294901760, %v1276_v6  ;;  %v1739_v12 = vsub.f32 %v191_v61, %v5155_v7  ;;  %v1734_v13 = vand.u32 4294901760, %v1733_v9  ;;  %v3134_v54 = vsub.f32 %v5108_v48, %v5239_v47 }
  0x1e   : > { %497 = vmatprep.subr.mxu1 %v259_v14  ;;  %532 = vmatprep.mubr.f32.mxu1 %v5004_v1  ;;  %v5259_v48 = vand.u32 4294901760, %v5111_v49  ;;  %v3599_v62 = vsub.f32 %v5120_v52, %v5267_v58  ;;  %v5287_v52 = vand.u32 4294901760, %v5141_v63 }
  0x1f   : > { %499 = vmatpush1.msra.mxu1 %v261_v15  ;;  %614 = vmatmul.mubr.f32.vlgmr.msra.gmra.mxu0 %v5034_v3  ;;  %v1735_v18 = vsub.f32 %v1733_v9, %v1734_v13 }
  0x20   : > { %651 = vmatprep.subr.mxu1 %v259_v14  ;;  %727 = vmatpush1.msra.mxu0 %v5066_v21  ;;  %v200_v14 = vsel %vm171_vm1, %v157_v10, 0 }
  0x21   : > { %760 = vmatprep.mubr.f32.mxu0 %v5004_v1  ;;  %536 = vmatmul.mubr.f32.vlgmr.msra.gmra.mxu1 %v5043_v5  ;;  %v5177_v19 = vand.u32 4294901760, %v200_v14  ;;  %v1736_v23 = vand.u32 4294901760, %v1735_v18 }
  0x22   : > { %886 = vmatprep.subr.mxu0 %v5069_v22  ;;  %653 = vmatpush1.msra.mxu1 %v261_v15  ;;  %v156_v15 = vld [vmem:[%s5050_s17 + $0x40] sm:$0x1f] }
  0x23   : > { %686 = vmatprep.mubr.f32.mxu1 %v5004_v1  ;;  %807 = vmatprep.subr.mxu1 %v806_v43  ;;  %v197_v20 = vsel %vm171_vm1, %v156_v15, 0  ;;  %v2198_v24 = vsub.f32 %v200_v14, %v5177_v19 }
  0x24   : > { %766 = vmatmul.mubr.f32.vlgmr.msra.gmra.mxu0 %v5061_v16  ;;  %v5185_v22 = vand.u32 4294901760, %v197_v20 }
  0x25   : > { %889 = vmatpush1.msra.mxu0 %v5075_v26  ;;  %922 = vmatprep.mubr.f32.mxu0 %v5004_v1  ;;  %v2199_v28 = vand.u32 4294901760, %v2198_v24 }
  0x26   : > { %688 = vmatmul.mubr.f32.vlgmr.msra.gmra.mxu1 %v5034_v3  ;;  %1040 = vmatprep.subr.mxu0 %v804_v29  ;;  %v2204_v27 = vsub.f32 %v197_v20, %v5185_v22  ;;  %v206_v29 = vsel %vm171_vm1, %v159_v25, 0 }
  0x27   : > { %813 = vmatpush1.msra.mxu1 %v812_v50  ;;  %846 = vmatprep.mubr.f32.mxu1 %v5004_v1  ;;  %v2200_v32 = vsub.f32 %v2198_v24, %v2199_v28  ;;  %v5205_v33 = vand.u32 4294901760, %v206_v29 }
  0x28   : > { %962 = vmatprep.subr.mxu1 %v5063_v17  ;;  %925 = vmatmul.mubr.f32.vlgmr.msra.gmra.mxu0 %v5039_v4  ;;  %v2205_v31 = vand.u32 4294901760, %v2204_v27 }
  0x29   : > { %1044 = vmatpush1.msra.mxu0 %v810_v34  ;;  %1077 = vmatprep.mubr.f32.mxu0 %v5004_v1  ;;  %v203_v34 = vsel %vm171_vm1, %v158_v30, 0  ;;  %v2201_v37 = vand.u32 4294901760, %v2200_v32  ;;  %v2663_v38 = vsub.f32 %v206_v29, %v5205_v33 }
  0x2a   : > { %848 = vmatmul.mubr.f32.vlgmr.msra.gmra.mxu1 %v5034_v3  ;;  %1190 = vmatprep.subr.mxu0 %v5085_v36  ;;  %v2206_v35 = vsub.f32 %v2204_v27, %v2205_v31 }
  0x2b   : > { %964 = vmatpush1.msra.mxu1 %v5066_v21  ;;  %997 = vmatprep.mubr.f32.mxu1 %v5004_v1  ;;  %v2664_v41 = vand.u32 4294901760, %v2663_v38 }
  0x2c   : > { %1116 = vmatprep.subr.mxu1 %v5063_v17  ;;  %1079 = vmatmul.mubr.f32.vlgmr.msra.gmra.mxu0 %v5034_v3  ;;  %v1740_v17 = vand.u32 4294901760, %v1739_v12  ;;  %v2207_v39 = vand.u32 4294901760, %v2206_v35 }
  0x2d   : > { %1192 = vmatpush1.msra.mxu0 %v5094_v42  ;;  %1225 = vmatprep.mubr.f32.mxu0 %v5004_v1  ;;  %v2665_v43 = vsub.f32 %v2663_v38, %v2664_v41 }
  0x2e   : > { %1001 = vmatmul.mubr.f32.vlgmr.msra.gmra.mxu1 %v5043_v5  ;;  %1351 = vmatprep.subr.mxu0 %v5098_v44  ;;  %v5231_v44 = vand.u32 4294901760, %v5101_v45 }
  0x2f   : > { %1118 = vmatpush1.msra.mxu1 %v5066_v21  ;;  %1151 = vmatprep.mubr.f32.mxu1 %v5004_v1  ;;  %v1741_v21 = vsub.f32 %v1739_v12, %v1740_v17  ;;  %v2666_v50 = vand.u32 4294901760, %v2665_v43 }
  0x30   : > { %1272 = vmatprep.subr.mxu1 %v1271_v8  ;;  %1231 = vmatmul.mubr.f32.vlgmr.msra.gmra.mxu0 %v5061_v16 }
  0x31   : > { %1354 = vmatpush1.msra.mxu0 %v5117_v51  ;;  %1387 = vmatprep.mubr.f32.mxu0 %v5004_v1  ;;  %v1742_v26 = vand.u32 4294901760, %v1741_v21  ;;  %v3128_v51 = vsub.f32 %v5101_v45, %v5231_v44  ;;  %v3135_v45 = vand.u32 4294901760, %v3134_v54 }
  0x32   : > { %1153 = vmatmul.mubr.f32.vlgmr.msra.gmra.mxu1 %v5034_v3  ;;  %1505 = vmatprep.subr.mxu0 %v1269_v53 }
  0x33   : > { %1278 = vmatpush1.msra.mxu1 %v1277_v11  ;;  %1311 = vmatprep.mubr.f32.mxu1 %v5004_v1  ;;  %v3129_v55 = vand.u32 4294901760, %v3128_v51  ;;  %v3136_v57 = vsub.f32 %v3134_v54, %v3135_v45  ;;  %v4058_v11 = vsub.f32 %v5141_v63, %v5287_v52 }
  0x34   : > { %1427 = vmatprep.subr.mxu1 %v5085_v36  ;;  %1390 = vmatmul.mubr.f32.vlgmr.msra.gmra.mxu0 %v5039_v4 }
  0x35   : > { %1509 = vmatpush1.msra.mxu0 %v1275_v59  ;;  %1542 = vmatprep.mubr.f32.mxu0 %v5004_v1  ;;  %v3130_v56 = vsub.f32 %v3128_v51, %v3129_v55  ;;  %v3137_v61 = vand.u32 4294901760, %v3136_v57  ;;  %v4059_v14 = vand.u32 4294901760, %v4058_v11 }
  0x36   : > { %1313 = vmatmul.mubr.f32.vlgmr.msra.gmra.mxu1 %v5034_v3  ;;  %1655 = vmatprep.subr.mxu0 %v5134_v60 }
  0x37   : > { %1429 = vmatpush1.msra.mxu1 %v5094_v42  ;;  %1462 = vmatprep.mubr.f32.mxu1 %v5004_v1  ;;  %v3131_v59 = vand.u32 4294901760, %v3130_v56  ;;  %v4060_v15 = vsub.f32 %v4058_v11, %v4059_v14 }
  0x38   : > { %1581 = vmatprep.subr.mxu1 %v5085_v36  ;;  %1544 = vmatmul.mubr.f32.vlgmr.msra.gmra.mxu0 %v5034_v3  ;;  %v5213_v36 = vand.u32 4294901760, %v203_v34 }
  0x39   : > { %1657 = vmatpush1.msra.mxu0 %v5155_v7  ;;  %1690 = vmatprep.mubr.f32.mxu0 %v5004_v1  ;;  %v4061_v18 = vand.u32 4294901760, %v4060_v15 }
  0x3a   : > { %1466 = vmatmul.mubr.f32.vlgmr.msra.gmra.mxu1 %v5043_v5  ;;  %1816 = vmatprep.subr.mxu0 %v1733_v9  ;;  %v2669_v40 = vsub.f32 %v203_v34, %v5213_v36  ;;  %v5295_v9 = vand.u32 4294901760, %v5144_v0 }
  0x3b   : > { %1583 = vmatpush1.msra.mxu1 %v5094_v42  ;;  %1616 = vmatprep.mubr.f32.mxu1 %v5004_v1 }
  0x3c   : > { %1737 = vmatprep.subr.mxu1 %v1736_v23  ;;  %1696 = vmatmul.mubr.f32.vlgmr.msra.gmra.mxu0 %v5061_v16  ;;  %v2670_v42 = vand.u32 4294901760, %v2669_v40 }
  0x3d   : > { %1819 = vmatpush1.msra.mxu0 %v1739_v12  ;;  %1852 = vmatprep.mubr.f32.mxu0 %v5004_v1 }
  0x3e   : > { %1618 = vmatmul.mubr.f32.vlgmr.msra.gmra.mxu1 %v5034_v3  ;;  %1970 = vmatprep.subr.mxu0 %v1734_v13  ;;  %v2671_v46 = vsub.f32 %v2669_v40, %v2670_v42  ;;  %v4064_v13 = vsub.f32 %v5144_v0, %v5295_v9 }
  0x3f   : > { %1743 = vmatpush1.msra.mxu1 %v1742_v26  ;;  %1776 = vmatprep.mubr.f32.mxu1 %v5004_v1 }
  0x40   : > { %1892 = vmatprep.subr.mxu1 %v5134_v60  ;;  %1855 = vmatmul.mubr.f32.vlgmr.msra.gmra.mxu0 %v5039_v4  ;;  %v2672_v53 = vand.u32 4294901760, %v2671_v46  ;;  %v4065_v63 = vand.u32 4294901760, %v4064_v13 }
  0x41   : > { %1974 = vmatpush1.msra.mxu0 %v1740_v17  ;;  %2007 = vmatprep.mubr.f32.mxu0 %v5004_v1  ;;  %v4445_v17 = vand.u32 4294901760, %v5147_v2 }
  0x42   : > { %1778 = vmatmul.mubr.f32.vlgmr.msra.gmra.mxu1 %v5034_v3  ;;  %2120 = vmatprep.subr.mxu0 %v5177_v19  ;;  %v4066_v0 = vsub.f32 %v4064_v13, %v4065_v63 }
  0x43   : > { %1894 = vmatpush1.msra.mxu1 %v5155_v7  ;;  %1927 = vmatprep.mubr.f32.mxu1 %v5004_v1  ;;  %v4522_v20 = vsub.f32 %v5147_v2, %v4445_v17 }
  0x44   : > { %2046 = vmatprep.subr.mxu1 %v5134_v60  ;;  %2009 = vmatmul.mubr.f32.vlgmr.msra.gmra.mxu0 %v5034_v3  ;;  %v3593_v60 = vsub.f32 %v5111_v49, %v5259_v48  ;;  %v3600_v49 = vand.u32 4294901760, %v3599_v62 }
  0x45   : > { %2122 = vmatpush1.msra.mxu0 %v5185_v22  ;;  %2155 = vmatprep.mubr.f32.mxu0 %v5004_v1  ;;  %v4523_v21 = vand.u32 4294901760, %v4522_v20 }
  0x46   : > { %1931 = vmatmul.mubr.f32.vlgmr.msra.gmra.mxu1 %v5043_v5  ;;  %2281 = vmatprep.subr.mxu0 %v2198_v24  ;;  %v3594_v6 = vand.u32 4294901760, %v3593_v60  ;;  %v3601_v8 = vsub.f32 %v3599_v62, %v3600_v49 }
  0x47   : > { %2048 = vmatpush1.msra.mxu1 %v5155_v7  ;;  %2081 = vmatprep.mubr.f32.mxu1 %v5004_v1  ;;  %v4524_v2 = vsub.f32 %v4522_v20, %v4523_v21 }
  0x48   : > { %2202 = vmatprep.subr.mxu1 %v2201_v37  ;;  %2161 = vmatmul.mubr.f32.vlgmr.msra.gmra.mxu0 %v5061_v16  ;;  %v3595_v7 = vsub.f32 %v3593_v60, %v3594_v6  ;;  %v3602_v12 = vand.u32 4294901760, %v3601_v8 }
  0x49   : > { %2284 = vmatpush1.msra.mxu0 %v2204_v27  ;;  %2317 = vmatprep.mubr.f32.mxu0 %v5004_v1 }
  0x4a   : > { %2083 = vmatmul.mubr.f32.vlgmr.msra.gmra.mxu1 %v5034_v3  ;;  %2435 = vmatprep.subr.mxu0 %v2199_v28  ;;  %v3596_v10 = vand.u32 4294901760, %v3595_v7 }
  0x4b   : > { %2208 = vmatpush1.msra.mxu1 %v2207_v39  ;;  %2241 = vmatprep.mubr.f32.mxu1 %v5004_v1 }
  0x4c   : > { %2357 = vmatprep.subr.mxu1 %v5177_v19  ;;  %2320 = vmatmul.mubr.f32.vlgmr.msra.gmra.mxu0 %v5039_v4 }
  0x4d   : > { %2439 = vmatpush1.msra.mxu0 %v2205_v31  ;;  %2472 = vmatprep.mubr.f32.mxu0 %v5004_v1 }
  0x4e   : > { %2243 = vmatmul.mubr.f32.vlgmr.msra.gmra.mxu1 %v5034_v3  ;;  %2585 = vmatprep.subr.mxu0 %v5205_v33 }
  0x4f   : > { %2359 = vmatpush1.msra.mxu1 %v5185_v22  ;;  %2392 = vmatprep.mubr.f32.mxu1 %v5004_v1 }
  0x50   : > { %2511 = vmatprep.subr.mxu1 %v5177_v19  ;;  %2474 = vmatmul.mubr.f32.vlgmr.msra.gmra.mxu0 %v5034_v3  ;;  %v4067_v19 = vand.u32 4294901760, %v4066_v0 }
  0x51   : > { %2587 = vmatpush1.msra.mxu0 %v5213_v36  ;;  %2620 = vmatprep.mubr.f32.mxu0 %v5004_v1 }
  0x52   : > { %2396 = vmatmul.mubr.f32.vlgmr.msra.gmra.mxu1 %v5043_v5  ;;  %2746 = vmatprep.subr.mxu0 %v2663_v38 }
  0x53   : > { %2513 = vmatpush1.msra.mxu1 %v5185_v22  ;;  %2546 = vmatprep.mubr.f32.mxu1 %v5004_v1  ;;  %v4525_v22 = vand.u32 4294901760, %v4524_v2 }
  0x54   : > { %2667 = vmatprep.subr.mxu1 %v2666_v50  ;;  %2626 = vmatmul.mubr.f32.vlgmr.msra.gmra.mxu0 %v5061_v16 }
  0x55   : > { %2749 = vmatpush1.msra.mxu0 %v2669_v40  ;;  %2782 = vmatprep.mubr.f32.mxu0 %v5004_v1 }
  0x56   : > { %2548 = vmatmul.mubr.f32.vlgmr.msra.gmra.mxu1 %v5034_v3  ;;  %2900 = vmatprep.subr.mxu0 %v2664_v41 }
  0x57   : > { %2673 = vmatpush1.msra.mxu1 %v2672_v53  ;;  %2706 = vmatprep.mubr.f32.mxu1 %v5004_v1 }
  0x58   : > { %2822 = vmatprep.subr.mxu1 %v5205_v33  ;;  %2785 = vmatmul.mubr.f32.vlgmr.msra.gmra.mxu0 %v5039_v4 }
  0x59   : > { %2904 = vmatpush1.msra.mxu0 %v2670_v42  ;;  %2937 = vmatprep.mubr.f32.mxu0 %v5004_v1 }
  0x5a   : > { %2708 = vmatmul.mubr.f32.vlgmr.msra.gmra.mxu1 %v5034_v3  ;;  %3050 = vmatprep.subr.mxu0 %v5231_v44 }
  0x5b   : > { %2824 = vmatpush1.msra.mxu1 %v5213_v36  ;;  %2857 = vmatprep.mubr.f32.mxu1 %v5004_v1 }
  0x5c   : > { %2976 = vmatprep.subr.mxu1 %v5205_v33  ;;  %2939 = vmatmul.mubr.f32.vlgmr.msra.gmra.mxu0 %v5034_v3 }
  0x5d   : > { %3052 = vmatpush1.msra.mxu0 %v5239_v47  ;;  %3085 = vmatprep.mubr.f32.mxu0 %v5004_v1 }
  0x5e   : > { %2861 = vmatmul.mubr.f32.vlgmr.msra.gmra.mxu1 %v5043_v5  ;;  %3211 = vmatprep.subr.mxu0 %v3128_v51 }
  0x5f   : > { %2978 = vmatpush1.msra.mxu1 %v5213_v36  ;;  %3011 = vmatprep.mubr.f32.mxu1 %v5004_v1 }
  0x60   : > { %3132 = vmatprep.subr.mxu1 %v3131_v59  ;;  %3091 = vmatmul.mubr.f32.vlgmr.msra.gmra.mxu0 %v5061_v16 }
  0x61   : > { %3214 = vmatpush1.msra.mxu0 %v3134_v54  ;;  %3247 = vmatprep.mubr.f32.mxu0 %v5004_v1 }
  0x62   : > { %3013 = vmatmul.mubr.f32.vlgmr.msra.gmra.mxu1 %v5034_v3  ;;  %3365 = vmatprep.subr.mxu0 %v3129_v55 }
  0x63   : > { %3138 = vmatpush1.msra.mxu1 %v3137_v61  ;;  %3171 = vmatprep.mubr.f32.mxu1 %v5004_v1 }
  0x64   : > { %3287 = vmatprep.subr.mxu1 %v5231_v44  ;;  %3250 = vmatmul.mubr.f32.vlgmr.msra.gmra.mxu0 %v5039_v4 }
  0x65   : > { %3369 = vmatpush1.msra.mxu0 %v3135_v45  ;;  %3402 = vmatprep.mubr.f32.mxu0 %v5004_v1 }
  0x66   : > { %3173 = vmatmul.mubr.f32.vlgmr.msra.gmra.mxu1 %v5034_v3  ;;  %3515 = vmatprep.subr.mxu0 %v5259_v48 }
  0x67   : > { %3289 = vmatpush1.msra.mxu1 %v5239_v47  ;;  %3322 = vmatprep.mubr.f32.mxu1 %v5004_v1 }
  0x68   : > { %3441 = vmatprep.subr.mxu1 %v5231_v44  ;;  %3404 = vmatmul.mubr.f32.vlgmr.msra.gmra.mxu0 %v5034_v3 }
  0x69   : > { %3517 = vmatpush1.msra.mxu0 %v5267_v58  ;;  %3550 = vmatprep.mubr.f32.mxu0 %v5004_v1 }
  0x6a   : > { %3326 = vmatmul.mubr.f32.vlgmr.msra.gmra.mxu1 %v5043_v5  ;;  %3676 = vmatprep.subr.mxu0 %v3593_v60 }
  0x6b   : > { %3443 = vmatpush1.msra.mxu1 %v5239_v47  ;;  %3476 = vmatprep.mubr.f32.mxu1 %v5004_v1 }
  0x6c   : > { %3597 = vmatprep.subr.mxu1 %v3596_v10  ;;  %3556 = vmatmul.mubr.f32.vlgmr.msra.gmra.mxu0 %v5061_v16 }
  0x6d   : > { %3679 = vmatpush1.msra.mxu0 %v3599_v62  ;;  %3712 = vmatprep.mubr.f32.mxu0 %v5004_v1 }
  0x6e   : > { %3478 = vmatmul.mubr.f32.vlgmr.msra.gmra.mxu1 %v5034_v3  ;;  %3830 = vmatprep.subr.mxu0 %v3594_v6 }
  0x6f   : > { %3603 = vmatpush1.msra.mxu1 %v3602_v12  ;;  %3636 = vmatprep.mubr.f32.mxu1 %v5004_v1 }
  0x70   : > { %3752 = vmatprep.subr.mxu1 %v5259_v48  ;;  %3715 = vmatmul.mubr.f32.vlgmr.msra.gmra.mxu0 %v5039_v4 }
  0x71   : > { %3834 = vmatpush1.msra.mxu0 %v3600_v49  ;;  %3867 = vmatprep.mubr.f32.mxu0 %v5004_v1 }
  0x72   : > { %3638 = vmatmul.mubr.f32.vlgmr.msra.gmra.mxu1 %v5034_v3  ;;  %3980 = vmatprep.subr.mxu0 %v5287_v52 }
  0x73   : > { %3754 = vmatpush1.msra.mxu1 %v5267_v58  ;;  %3787 = vmatprep.mubr.f32.mxu1 %v5004_v1 }
  0x74   : > { %3906 = vmatprep.subr.mxu1 %v5259_v48  ;;  %3869 = vmatmul.mubr.f32.vlgmr.msra.gmra.mxu0 %v5034_v3 }
  0x75   : > { %3982 = vmatpush1.msra.mxu0 %v5295_v9  ;;  %4015 = vmatprep.mubr.f32.mxu0 %v5004_v1 }
  0x76   : > { %3791 = vmatmul.mubr.f32.vlgmr.msra.gmra.mxu1 %v5043_v5  ;;  %4141 = vmatprep.subr.mxu0 %v4058_v11 }
  0x77   : > { %3908 = vmatpush1.msra.mxu1 %v5267_v58  ;;  %3941 = vmatprep.mubr.f32.mxu1 %v5004_v1 }
  0x78   : > { %4062 = vmatprep.subr.mxu1 %v4061_v18  ;;  %4021 = vmatmul.mubr.f32.vlgmr.msra.gmra.mxu0 %v5061_v16 }
  0x79   : > { %4144 = vmatpush1.msra.mxu0 %v4064_v13  ;;  %4177 = vmatprep.mubr.f32.mxu0 %v5004_v1 }
  0x7a   : > { %3943 = vmatmul.mubr.f32.vlgmr.msra.gmra.mxu1 %v5034_v3  ;;  %4295 = vmatprep.subr.mxu0 %v4059_v14 }
  0x7b   : > { %4068 = vmatpush1.msra.mxu1 %v4067_v19  ;;  %4101 = vmatprep.mubr.f32.mxu1 %v5004_v1 }
  0x7c   : > { %4217 = vmatprep.subr.mxu1 %v5287_v52  ;;  %4180 = vmatmul.mubr.f32.vlgmr.msra.gmra.mxu0 %v5039_v4 }
  0x7d   : > { %4299 = vmatpush1.msra.mxu0 %v4065_v63  ;;  %4332 = vmatprep.mubr.f32.mxu0 %v5004_v1 }
  0x7e   : > { %4103 = vmatmul.mubr.f32.vlgmr.msra.gmra.mxu1 %v5034_v3  ;;  %4956 = vmatprep.subr.mxu0 %v5004_v1 }
  0x7f   : > { %4219 = vmatpush1.msra.mxu1 %v5295_v9  ;;  %4252 = vmatprep.mubr.f32.mxu1 %v5004_v1 }
  0x80   : > { %4371 = vmatprep.subr.mxu1 %v5287_v52  ;;  %4334 = vmatmul.mubr.f32.vlgmr.msra.gmra.mxu0 %v5034_v3 }
  0x81   : > { %4957 = vmatpush3.msra.mxu0 %v4445_v17  ;;  %4958 = vmatprep.mubr.msk.f32.mxu0 %vm5005_vm2, %v5004_v1 }
  0x82   : > { %4256 = vmatmul.mubr.f32.vlgmr.msra.gmra.mxu1 %v5043_v5  ;;  %4966 = vmatprep.subr.mxu0 %v5004_v1 }
  0x83   : > { %4373 = vmatpush1.msra.mxu1 %v5295_v9  ;;  %4406 = vmatprep.mubr.f32.mxu1 %v5004_v1 }
  0x84   : > { %4961 = vmatprep.subr.mxu1 %v5004_v1  ;;  %4959 = vmatmul.mubr.f32.vlgmr.msra.gmra.mxu0 %v5061_v16 }
  0x85   : > { %4967 = vmatpush3.msra.mxu0 %v4522_v20  ;;  %4968 = vmatprep.mubr.msk.f32.mxu0 %vm5005_vm2, %v5004_v1 }
  0x86   : > { %4408 = vmatmul.mubr.f32.vlgmr.msra.gmra.mxu1 %v5034_v3  ;;  %4976 = vmatprep.subr.mxu0 %v5004_v1 }
  0x87   : > { %4962 = vmatpush3.msra.mxu1 %v4525_v22  ;;  %4963 = vmatprep.mubr.msk.f32.mxu1 %vm5005_vm2, %v5004_v1 }
  0x88   : > { %4971 = vmatprep.subr.mxu1 %v5004_v1  ;;  %4969 = vmatmul.mubr.f32.vlgmr.msra.gmra.mxu0 %v5039_v4 }
  0x89   : > { %4977 = vmatpush3.msra.mxu0 %v4523_v21  ;;  %4978 = vmatprep.mubr.msk.f32.mxu0 %vm5005_vm2, %v5004_v1 }
  0x8a   : > { %4964 = vmatmul.mubr.f32.vlgmr.msra.gmra.mxu1 %v5034_v3 }
  0x8b   : > { %4972 = vmatpush3.msra.mxu1 %v4445_v17  ;;  %4973 = vmatprep.mubr.msk.f32.mxu1 %vm5005_vm2, %v5004_v1 }
  0x8c   : > { %4981 = vmatprep.subr.mxu1 %v5004_v1  ;;  %4979 = vmatmul.mubr.f32.vlgmr.msra.gmra.mxu0 %v5034_v3 }
  0x8e   : > { %4974 = vmatmul.mubr.f32.vlgmr.msra.gmra.mxu1 %v5043_v5 }
  0x8f   : > { %4982 = vmatpush3.msra.mxu1 %v4445_v17  ;;  %4983 = vmatprep.mubr.msk.f32.mxu1 %vm5005_vm2, %v5004_v1 }
  0x92   : > { %4984 = vmatmul.mubr.f32.vlgmr.msra.gmra.mxu1 %v5034_v3 }
  0xd7   : > { %v302_v4 = vpop.f32.mrf.mxu0 }
  0xd9   : > { %v304_v16 = vpop.f32.mrf.mxu0 }
  0xdb   : > { %v461_v23 = vpop.f32.mrf.mxu0 }
  0xdd   : > { %v463_v24 = vpop.f32.mrf.mxu0  ;;  %v384_v25 = vpop.f32.mrf.mxu1 }
  0xde   : > { %v385_v26 = vadd.f32 %v384_v25, %v302_v4 }
  0xdf   : > { %v386_v27 = vpop.f32.mrf.mxu1  ;;  %v615_v28 = vpop.f32.mrf.mxu0 }
  0xe0   : > { %v462_v29 = vadd.f32 %v461_v23, %v385_v26  ;;  %v387_v30 = vadd.f32 %v386_v27, %v304_v16 }
  0xe1   : > { %v537_v31 = vpop.f32.mrf.mxu1  ;;  %v617_v32 = vpop.f32.mrf.mxu0 }
  0xe2   : > { %v464_v5 = vadd.f32 %v463_v24, %v387_v30  ;;  %v538_v33 = vadd.f32 %v537_v31, %v462_v29 }
  0xe3   : > { %v539_v34 = vpop.f32.mrf.mxu1 }
  0xe4   : > { %v767_v35 = vpop.f32.mrf.mxu0  ;;  %v616_v1 = vadd.f32 %v615_v28, %v538_v33  ;;  %v540_v36 = vadd.f32 %v539_v34, %v464_v5 }
  0xe6   : > { %v689_v3 = vpop.f32.mrf.mxu1  ;;  %v769_v37 = vpop.f32.mrf.mxu0  ;;  %v618_v38 = vadd.f32 %v617_v32, %v540_v36 }
  0xe7   : > { %v690_v39 = vadd.f32 %v689_v3, %v616_v1 }
  0xe8   : > { %v691_v40 = vpop.f32.mrf.mxu1  ;;  %v926_v41 = vpop.f32.mrf.mxu0 }
  0xe9   : > { %4860 = vst [vmem:[%s5373_s20] sm:$0xff] %v690_v39  ;;  %v692_v42 = vadd.f32 %v691_v40, %v618_v38 }
  0xea   : > { %v849_v43 = vpop.f32.mrf.mxu1  ;;  %v928_v44 = vpop.f32.mrf.mxu0 }
  0xeb   : > { %4861 = vst [vmem:[%s5373_s20 + $0x8] sm:$0xff] %v692_v42  ;;  %v850_v46 = vadd.f32 %v849_v43, %v767_v35 }
  0xec   : > { %v851_v47 = vpop.f32.mrf.mxu1  ;;  %v1080_v50 = vpop.f32.mrf.mxu0 }
  0xed   : > { %v927_v51 = vadd.f32 %v926_v41, %v850_v46  ;;  %v852_v53 = vadd.f32 %v851_v47, %v769_v37 }
  0xee   : > { %v1002_v54 = vpop.f32.mrf.mxu1  ;;  %v1082_v55 = vpop.f32.mrf.mxu0 }
  0xef   : > { %v929_v45 = vadd.f32 %v928_v44, %v852_v53  ;;  %v1003_v56 = vadd.f32 %v1002_v54, %v927_v51 }
  0xf0   : > { %v1004_v48 = vpop.f32.mrf.mxu1  ;;  %v1232_v57 = vpop.f32.mrf.mxu0 }
  0xf1   : > { %v1081_v58 = vadd.f32 %v1080_v50, %v1003_v56  ;;  %v1005_v59 = vadd.f32 %v1004_v48, %v929_v45 }
  0xf2   : > { %v1154_v60 = vpop.f32.mrf.mxu1  ;;  %v1234_v61 = vpop.f32.mrf.mxu0 }
  0xf3   : > { %v1083_v62 = vadd.f32 %v1082_v55, %v1005_v59  ;;  %v1155_v6 = vadd.f32 %v1154_v60, %v1081_v58 }
  0xf4   : > { %v1156_v49 = vpop.f32.mrf.mxu1  ;;  %v1391_v7 = vpop.f32.mrf.mxu0 }
  0xf5   : > { %4862 = vst [vmem:[%s5373_s20 + $0x10] sm:$0xff] %v1155_v6  ;;  %v1157_v52 = vadd.f32 %v1156_v49, %v1083_v62 }
  0xf6   : > { %v1314_v8 = vpop.f32.mrf.mxu1  ;;  %v1393_v9 = vpop.f32.mrf.mxu0 }
  0xf7   : > { %4863 = vst [vmem:[%s5373_s20 + $0x18] sm:$0xff] %v1157_v52  ;;  %v1315_v10 = vadd.f32 %v1314_v8, %v1232_v57 }
  0xf8   : > { %v1316_v11 = vpop.f32.mrf.mxu1  ;;  %v1545_v12 = vpop.f32.mrf.mxu0 }
  0xf9   : > { %v1392_v13 = vadd.f32 %v1391_v7, %v1315_v10  ;;  %v1317_v14 = vadd.f32 %v1316_v11, %v1234_v61 }
  0xfa   : > { %v1467_v63 = vpop.f32.mrf.mxu1  ;;  %v1547_v15 = vpop.f32.mrf.mxu0 }
  0xfb   : > { %v1394_v0 = vadd.f32 %v1393_v9, %v1317_v14  ;;  %v1468_v17 = vadd.f32 %v1467_v63, %v1392_v13 }
  0xfc   : > { %v1469_v18 = vpop.f32.mrf.mxu1  ;;  %v1697_v19 = vpop.f32.mrf.mxu0 }
  0xfd   : > { %v1546_v20 = vadd.f32 %v1545_v12, %v1468_v17  ;;  %v1470_v21 = vadd.f32 %v1469_v18, %v1394_v0 }
  0xfe   : > { %v1619_v2 = vpop.f32.mrf.mxu1  ;;  %v1699_v22 = vpop.f32.mrf.mxu0 }
  0xff   : > { %v1548_v4 = vadd.f32 %v1547_v15, %v1470_v21  ;;  %v1620_v16 = vadd.f32 %v1619_v2, %v1546_v20 }
 0x100   : > { %v1621_v23 = vpop.f32.mrf.mxu1  ;;  %v1856_v24 = vpop.f32.mrf.mxu0 }
 0x101   : > { %4864 = vst [vmem:[%s5373_s20 + $0x20] sm:$0xff] %v1620_v16  ;;  %v1622_v25 = vadd.f32 %v1621_v23, %v1548_v4 }
 0x102   : > { %v1779_v26 = vpop.f32.mrf.mxu1  ;;  %v1858_v27 = vpop.f32.mrf.mxu0 }
 0x103   : > { %4865 = vst [vmem:[%s5373_s20 + $0x28] sm:$0xff] %v1622_v25  ;;  %v1780_v28 = vadd.f32 %v1779_v26, %v1697_v19 }
 0x104   : > { %v1781_v29 = vpop.f32.mrf.mxu1  ;;  %v2010_v30 = vpop.f32.mrf.mxu0 }
 0x105   : > { %v1857_v31 = vadd.f32 %v1856_v24, %v1780_v28  ;;  %v1782_v32 = vadd.f32 %v1781_v29, %v1699_v22 }
 0x106   : > { %v1932_v5 = vpop.f32.mrf.mxu1  ;;  %v2012_v33 = vpop.f32.mrf.mxu0 }
 0x107   : > { %v1859_v34 = vadd.f32 %v1858_v27, %v1782_v32  ;;  %v1933_v35 = vadd.f32 %v1932_v5, %v1857_v31 }
 0x108   : > { %v1934_v1 = vpop.f32.mrf.mxu1  ;;  %v2162_v36 = vpop.f32.mrf.mxu0 }
 0x109   : > { %v2011_v3 = vadd.f32 %v2010_v30, %v1933_v35  ;;  %v1935_v37 = vadd.f32 %v1934_v1, %v1859_v34 }
 0x10a   : > { %v2084_v38 = vpop.f32.mrf.mxu1  ;;  %v2164_v39 = vpop.f32.mrf.mxu0 }
 0x10b   : > { %v2013_v40 = vadd.f32 %v2012_v33, %v1935_v37  ;;  %v2085_v41 = vadd.f32 %v2084_v38, %v2011_v3 }
 0x10c   : > { %v2086_v42 = vpop.f32.mrf.mxu1  ;;  %v2321_v43 = vpop.f32.mrf.mxu0 }
 0x10d   : > { %4866 = vst [vmem:[%s5373_s20 + $0x30] sm:$0xff] %v2085_v41  ;;  %v2087_v44 = vadd.f32 %v2086_v42, %v2013_v40 }
 0x10e   : > { %v2244_v46 = vpop.f32.mrf.mxu1  ;;  %v2323_v47 = vpop.f32.mrf.mxu0 }
 0x10f   : > { %4867 = vst [vmem:[%s5373_s20 + $0x38] sm:$0xff] %v2087_v44  ;;  %v2245_v50 = vadd.f32 %v2244_v46, %v2162_v36 }
 0x110   : > { %v2246_v51 = vpop.f32.mrf.mxu1  ;;  %v2475_v53 = vpop.f32.mrf.mxu0 }
 0x111   : > { %v2322_v54 = vadd.f32 %v2321_v43, %v2245_v50  ;;  %v2247_v55 = vadd.f32 %v2246_v51, %v2164_v39 }
 0x112   : > { %v2397_v45 = vpop.f32.mrf.mxu1  ;;  %v2477_v56 = vpop.f32.mrf.mxu0 }
 0x113   : > { %v2324_v48 = vadd.f32 %v2323_v47, %v2247_v55  ;;  %v2398_v57 = vadd.f32 %v2397_v45, %v2322_v54 }
 0x114   : > { %v2399_v58 = vpop.f32.mrf.mxu1  ;;  %v2627_v59 = vpop.f32.mrf.mxu0 }
 0x115   : > { %v2476_v60 = vadd.f32 %v2475_v53, %v2398_v57  ;;  %v2400_v61 = vadd.f32 %v2399_v58, %v2324_v48 }
 0x116   : > { %v2549_v62 = vpop.f32.mrf.mxu1  ;;  %v2629_v6 = vpop.f32.mrf.mxu0 }
 0x117   : > { %v2478_v49 = vadd.f32 %v2477_v56, %v2400_v61  ;;  %v2550_v7 = vadd.f32 %v2549_v62, %v2476_v60 }
 0x118   : > { %v2551_v52 = vpop.f32.mrf.mxu1  ;;  %v2786_v8 = vpop.f32.mrf.mxu0 }
 0x119   : > { %4868 = vst [vmem:[%s5373_s20 + $0x40] sm:$0xff] %v2550_v7  ;;  %v2552_v9 = vadd.f32 %v2551_v52, %v2478_v49 }
 0x11a   : > { %v2709_v10 = vpop.f32.mrf.mxu1  ;;  %v2788_v11 = vpop.f32.mrf.mxu0 }
 0x11b   : > { %4869 = vst [vmem:[%s5373_s20 + $0x48] sm:$0xff] %v2552_v9  ;;  %v2710_v12 = vadd.f32 %v2709_v10, %v2627_v59 }
 0x11c   : > { %v2711_v13 = vpop.f32.mrf.mxu1  ;;  %v2940_v14 = vpop.f32.mrf.mxu0 }
 0x11d   : > { %v2787_v63 = vadd.f32 %v2786_v8, %v2710_v12  ;;  %v2712_v15 = vadd.f32 %v2711_v13, %v2629_v6 }
 0x11e   : > { %v2862_v0 = vpop.f32.mrf.mxu1  ;;  %v2942_v17 = vpop.f32.mrf.mxu0 }
 0x11f   : > { %v2789_v18 = vadd.f32 %v2788_v11, %v2712_v15  ;;  %v2863_v19 = vadd.f32 %v2862_v0, %v2787_v63 }
 0x120   : > { %v2864_v20 = vpop.f32.mrf.mxu1  ;;  %v3092_v21 = vpop.f32.mrf.mxu0 }
 0x121   : > { %v2941_v2 = vadd.f32 %v2940_v14, %v2863_v19  ;;  %v2865_v22 = vadd.f32 %v2864_v20, %v2789_v18 }
 0x122   : > { %v3014_v4 = vpop.f32.mrf.mxu1  ;;  %v3094_v16 = vpop.f32.mrf.mxu0 }
 0x123   : > { %v2943_v23 = vadd.f32 %v2942_v17, %v2865_v22  ;;  %v3015_v24 = vadd.f32 %v3014_v4, %v2941_v2 }
 0x124   : > { %v3016_v25 = vpop.f32.mrf.mxu1  ;;  %v3251_v26 = vpop.f32.mrf.mxu0 }
 0x125   : > { %4870 = vst [vmem:[%s5373_s20 + $0x50] sm:$0xff] %v3015_v24  ;;  %v3017_v27 = vadd.f32 %v3016_v25, %v2943_v23 }
 0x126   : > { %v3174_v28 = vpop.f32.mrf.mxu1  ;;  %v3253_v29 = vpop.f32.mrf.mxu0 }
 0x127   : > { %4871 = vst [vmem:[%s5373_s20 + $0x58] sm:$0xff] %v3017_v27  ;;  %v3175_v30 = vadd.f32 %v3174_v28, %v3092_v21 }
 0x128   : > { %v3176_v31 = vpop.f32.mrf.mxu1  ;;  %v3405_v32 = vpop.f32.mrf.mxu0 }
 0x129   : > { %v3252_v5 = vadd.f32 %v3251_v26, %v3175_v30  ;;  %v3177_v33 = vadd.f32 %v3176_v31, %v3094_v16 }
 0x12a   : > { %v3327_v34 = vpop.f32.mrf.mxu1  ;;  %v3407_v35 = vpop.f32.mrf.mxu0 }
 0x12b   : > { %v3254_v1 = vadd.f32 %v3253_v29, %v3177_v33  ;;  %v3328_v36 = vadd.f32 %v3327_v34, %v3252_v5 }
 0x12c   : > { %v3329_v3 = vpop.f32.mrf.mxu1  ;;  %v3557_v37 = vpop.f32.mrf.mxu0 }
 0x12d   : > { %v3406_v38 = vadd.f32 %v3405_v32, %v3328_v36  ;;  %v3330_v39 = vadd.f32 %v3329_v3, %v3254_v1 }
 0x12e   : > { %v3479_v40 = vpop.f32.mrf.mxu1  ;;  %v3559_v41 = vpop.f32.mrf.mxu0 }
 0x12f   : > { %v3408_v42 = vadd.f32 %v3407_v35, %v3330_v39  ;;  %v3480_v43 = vadd.f32 %v3479_v40, %v3406_v38 }
 0x130   : > { %v3481_v44 = vpop.f32.mrf.mxu1  ;;  %v3716_v46 = vpop.f32.mrf.mxu0 }
 0x131   : > { %4872 = vst [vmem:[%s5373_s20 + $0x60] sm:$0xff] %v3480_v43  ;;  %v3482_v47 = vadd.f32 %v3481_v44, %v3408_v42 }
 0x132   : > { %v3639_v50 = vpop.f32.mrf.mxu1  ;;  %v3718_v51 = vpop.f32.mrf.mxu0 }
 0x133   : > { %4873 = vst [vmem:[%s5373_s20 + $0x68] sm:$0xff] %v3482_v47  ;;  %v3640_v53 = vadd.f32 %v3639_v50, %v3557_v37 }
 0x134   : > { %v3641_v54 = vpop.f32.mrf.mxu1  ;;  %v3870_v55 = vpop.f32.mrf.mxu0 }
 0x135   : > { %v3717_v45 = vadd.f32 %v3716_v46, %v3640_v53  ;;  %v3642_v56 = vadd.f32 %v3641_v54, %v3559_v41 }
 0x136   : > { %v3792_v48 = vpop.f32.mrf.mxu1  ;;  %v3872_v57 = vpop.f32.mrf.mxu0 }
 0x137   : > { %v3719_v58 = vadd.f32 %v3718_v51, %v3642_v56  ;;  %v3793_v59 = vadd.f32 %v3792_v48, %v3717_v45 }
 0x138   : > { %v3794_v60 = vpop.f32.mrf.mxu1  ;;  %v4022_v61 = vpop.f32.mrf.mxu0 }
 0x139   : > { %v3871_v62 = vadd.f32 %v3870_v55, %v3793_v59  ;;  %v3795_v6 = vadd.f32 %v3794_v60, %v3719_v58 }
 0x13a   : > { %v3944_v49 = vpop.f32.mrf.mxu1  ;;  %v4024_v7 = vpop.f32.mrf.mxu0 }
 0x13b   : > { %v3873_v52 = vadd.f32 %v3872_v57, %v3795_v6  ;;  %v3945_v8 = vadd.f32 %v3944_v49, %v3871_v62 }
 0x13c   : > { %v3946_v9 = vpop.f32.mrf.mxu1  ;;  %v4181_v10 = vpop.f32.mrf.mxu0 }
 0x13d   : > { %4874 = vst [vmem:[%s5373_s20 + $0x70] sm:$0xff] %v3945_v8  ;;  %v3947_v11 = vadd.f32 %v3946_v9, %v3873_v52 }
 0x13e   : > { %v4104_v12 = vpop.f32.mrf.mxu1  ;;  %v4183_v13 = vpop.f32.mrf.mxu0 }
 0x13f   : > { %4875 = vst [vmem:[%s5373_s20 + $0x78] sm:$0xff] %v3947_v11  ;;  %v4105_v14 = vadd.f32 %v4104_v12, %v4022_v61 }
 0x140   : > { %v4106_v63 = vpop.f32.mrf.mxu1  ;;  %v4335_v15 = vpop.f32.mrf.mxu0 }
 0x141   : > { %v4182_v0 = vadd.f32 %v4181_v10, %v4105_v14  ;;  %v4107_v17 = vadd.f32 %v4106_v63, %v4024_v7 }
 0x142   : > { %v4257_v18 = vpop.f32.mrf.mxu1  ;;  %v4337_v19 = vpop.f32.mrf.mxu0 }
 0x143   : > { %v4184_v20 = vadd.f32 %v4183_v13, %v4107_v17  ;;  %v4258_v21 = vadd.f32 %v4257_v18, %v4182_v0 }
 0x144   : > { %v4259_v2 = vpop.f32.mrf.mxu1  ;;  %v4486_v22 = vpop.f32.mrf.mxu0 }
 0x145   : > { %v4336_v4 = vadd.f32 %v4335_v15, %v4258_v21  ;;  %v4260_v16 = vadd.f32 %v4259_v2, %v4184_v20 }
 0x146   : > { %v4409_v23 = vpop.f32.mrf.mxu1  ;;  %v4960_v24 = vpop.f32.mrf.mxu0 }
 0x147   : > { %v4338_v25 = vadd.f32 %v4337_v19, %v4260_v16  ;;  %v4410_v26 = vadd.f32 %v4409_v23, %v4336_v4 }
 0x148   : > { %v4411_v27 = vpop.f32.mrf.mxu1  ;;  %v4636_v28 = vpop.f32.mrf.mxu0 }
 0x149   : > { %4876 = vst [vmem:[%s5373_s20 + $0x80] sm:$0xff] %v4410_v26  ;;  %v4412_v29 = vadd.f32 %v4411_v27, %v4338_v25 }
 0x14a   : > { %v4562_v30 = vpop.f32.mrf.mxu1  ;;  %v4970_v31 = vpop.f32.mrf.mxu0 }
 0x14b   : > { %4877 = vst [vmem:[%s5373_s20 + $0x88] sm:$0xff] %v4412_v29  ;;  %v4563_v32 = vadd.f32 %v4562_v30, %v4486_v22 }
 0x14c   : > { %v4965_v5 = vpop.f32.mrf.mxu1  ;;  %v4784_v33 = vpop.f32.mrf.mxu0 }
 0x14d   : > { %v4637_v34 = vadd.f32 %v4636_v28, %v4563_v32 }
 0x14e   : > { %v4710_v35 = vpop.f32.mrf.mxu1  ;;  %v4980_v1 = vpop.f32.mrf.mxu0 }
 0x14f   : > { %v4711_v36 = vadd.f32 %v4710_v35, %v4637_v34 }
 0x150   : > { %v4975_v3 = vpop.f32.mrf.mxu1 }
 0x151   : > { %v4785_v37 = vadd.f32 %v4784_v33, %v4711_v36 }
 0x152   : > { %v4856_v38 = vpop.f32.mrf.mxu1 }
 0x153   : > { %v4857_v39 = vadd.f32 %v4856_v38, %v4785_v37 }
 0x154   : > { %v4985_v40 = vpop.f32.mrf.mxu1 }
 0x155   : > { %4878 = vst [vmem:[%s5373_s20 + $0x90] sm:$0xff] %v4857_v39 }
 0x156 PF: > { %s12_s9 = sadd.s32 1, %s5002_s9  }
 0x157   : > { %p9_p4 = scmp.ge.s32.totalorder %s12_s9, 4  }
 0x159   :  { %11 = sbr.rel (!%p9_p4) target bundleno = 1 (0x1), region = 58 }

</bundles_post_ra>
